<compile_context>
chip_gen: v5e
topology: v5e:2x2
jax: 0.10.0
libtpu: 0.0.40
codegen_flags: <defaults>
</compile_context>

<pallas_src>
import functools

import numpy as np
import jax
import jax.numpy as jnp
from jax import lax
from jax.experimental import pallas as pl
from jax.experimental.pallas import tpu as pltpu


# ----------------------------- parameter setup ------------------------------

def gkern(kernlen=3, std=2.0):
    """1D + 2D Gaussian kernel (matches the scipy.signal.gaussian based gkern)."""
    n = np.arange(kernlen, dtype=np.float64) - (kernlen - 1) / 2.0
    g1 = np.exp(-0.5 * (n / std) ** 2)
    return g1, np.outer(g1, g1)


@functools.lru_cache(maxsize=None)
def _gauss_params():
    """Gaussian taps and the PyTorch-module output scale as Python floats."""
    g1, g2d = gkern(3, 2.0)
    ksum = float(np.float32(g2d.astype(np.float32).sum()))
    scale = 0.2 / (ksum * 3.0)            # 0.2 / (sum(conv1 weights) * 3)
    return float(g1[0]), float(g1[1]), scale   # off-tap, center-tap (= 1.0), scale


def _pick_tn(n, h, w, itemsize, lane_cap=256, min_blocks=8,
             max_block_bytes=4 << 20):
    """Images per grid step.

    Priorities: lane-dense (TN*W % 128 == 0), per-step lane width <= lane_cap
    (bounds vreg pressure / per-step VMEM), and >= min_blocks grid steps when
    the batch allows it so the pipeline overlaps and both v7x cores get >= 4
    steps.  Falls back gracefully for awkward/tiny shapes.
    """
    def fits(t):                      # x + out, double-buffered
        return 4 * h * t * w * itemsize <= max_block_bytes

    divs = [t for t in range(1, n + 1) if n % t == 0]
    dense = [t for t in divs if (t * w) % 128 == 0 and fits(t)]
    capped = [t for t in dense if t * w <= lane_cap]
    if capped:
        deep = [t for t in capped if n // t >= min_blocks]
        return max(deep) if deep else max(capped)
    if dense:
        return min(dense)             # lane-dense but wider than the cap
    fitting = [t for t in divs if fits(t)] or [1]
    return max(fitting)               # tiny/awkward batch: may be lane-sparse


# ------------------------------- Pallas kernel -------------------------------

def _detection_head_kernel(bias_ref, x_ref, o_ref, *, W, g_off, g_ctr, scale):
    # bias_ref: SMEM (1,) f32    precomputed (b1 + b2 + b3) * scale
    # x_ref   : VMEM (H, LW)     lane-packed batch tile, LW = TN * W
    # o_ref   : VMEM (H, LW)
    H, LW = x_ref.shape
    xs = jax.nn.sigmoid(x_ref[...].astype(jnp.float32))           # EUP, f32

    row = lax.broadcasted_iota(jnp.int32, (H, LW), 0)              # image row h
    col = lax.broadcasted_iota(jnp.int32, (H, LW), 1) % W          # in-image col w

    acc = jnp.zeros((H, LW), jnp.float32)
    for d in (1, 2, 3):            # unrolled; every shift below is static
        # ---- rows (sublane axis): 3-tap dilated conv, zero padded at H edges.
        # pltpu.roll follows np.roll semantics: roll(x, s, a)[i] = x[i - s].
        up = jnp.where(row < H - d, pltpu.roll(xs, H - d, axis=0), 0.0)  # xs[h+d]
        dn = jnp.where(row >= d, pltpu.roll(xs, d, axis=0), 0.0)         # xs[h-d]
        t = g_ctr * xs + g_off * (up + dn)
        # ---- cols (lane axis): 3-tap dilated conv, zero padded at each
        # image's W edges; the col mask also zeroes any value rolled in from a
        # neighbouring lane-packed image (or the block wrap-around).
        lt = jnp.where(col < W - d, pltpu.roll(t, LW - d, axis=1), 0.0)  # t[:, w+d]
        rt = jnp.where(col >= d, pltpu.roll(t, d, axis=1), 0.0)          # t[:, w-d]
        acc = acc + (g_ctr * t + g_off * (lt + rt))

    out = xs * jnp.float32(0.8) + acc * jnp.float32(scale) + bias_ref[0]
    o_ref[...] = jnp.clip(out, 0.0, 1.0).astype(o_ref.dtype)


# --------------------------------- wrapper -----------------------------------

@jax.jit
def detection_head(x_nchw, bias):
    """Pallas implementation of DetectionHead.forward.  x_nchw: (N, 1, H, W)."""
    N, C, H, W = x_nchw.shape
    assert C == 1, "DetectionHead uses Conv2d(1, 1, ...); C must be 1"

    itemsize = x_nchw.dtype.itemsize
    TN = _pick_tn(N, H, W, itemsize)
    LW = TN * W
    num_blocks = N // TN

    g_off, g_ctr, scale = _gauss_params()
    bias_term = (jnp.sum(bias.astype(jnp.float32)) * jnp.float32(scale)).reshape(1)

    # Lane-dense layout: (N,1,H,W) -> (H, N*W) with lane index n*W + w.
    x2 = jnp.transpose(x_nchw.reshape(N, H, W), (1, 0, 2)).reshape(H, N * W)

    # VMEM budget: in + out tiles, double-buffered, plus headroom; never more
    # than 32 MiB or (device VMEM - 16 MiB).
    footprint = 4 * H * LW * itemsize
    try:
        vmem_cap = int(pltpu.get_tpu_info().vmem_capacity_bytes)
    except Exception:
        vmem_cap = 64 << 20                      # v7x per-core (smallest gen)
    vmem_limit = int(min(max(2 * footprint, 4 << 20), 32 << 20,
                         max(vmem_cap - (16 << 20), 4 << 20)))

    elems = N * H * W
    cost = pl.CostEstimate(
        flops=int(60 * elems),                   # 3 dilations of shifted-adds + blend
        transcendentals=int(elems),              # sigmoid
        bytes_accessed=int(2 * elems * itemsize))

    kernel = functools.partial(_detection_head_kernel, W=W, g_off=g_off,
                               g_ctr=g_ctr, scale=scale)

    out2 = pl.pallas_call(
        kernel,
        out_shape=jax.ShapeDtypeStruct((H, N * W), x_nchw.dtype),
        grid=(num_blocks,),
        in_specs=[
            pl.BlockSpec(memory_space=pltpu.MemorySpace.SMEM),   # bias_term (1,)
            pl.BlockSpec((H, LW), lambda i: (0, i)),             # x batch tile
        ],
        out_specs=pl.BlockSpec((H, LW), lambda i: (0, i)),
        compiler_params=pltpu.CompilerParams(
            dimension_semantics=("parallel",),
            vmem_limit_bytes=vmem_limit),
        cost_estimate=cost,
    )(bias_term, x2)

    return jnp.transpose(out2.reshape(H, N, W), (1, 0, 2)).reshape(N, C, H, W)


# ------------------------------ pure-JAX reference ---------------------------

def detection_head_reference(x_nchw, bias):
    g1, g2d = gkern(3, 2.0)
    ksum = float(np.float32(g2d.astype(np.float32).sum()))
    scale = 0.2 / (ksum * 3.0)
    xs = jax.nn.sigmoid(x_nchw)
    w = jnp.asarray(g2d, jnp.float32)[None, None]                  # OIHW
    y = 0.0
    for i, d in enumerate((1, 2, 3)):
        y = y + lax.conv_general_dilated(
            xs, w, window_strides=(1, 1), padding=((d, d), (d, d)),
            rhs_dilation=(d, d), precision=lax.Precision.HIGHEST) + bias[i]
    return jnp.clip(xs * 0.8 + y * scale, 0.0, 1.0)


# ------------------------------------ main ------------------------------------

if __name__ == "__main__":
    key = jax.random.PRNGKey(0)
    kx, kb = jax.random.split(key)

    # Small, but batched enough to exercise an 8-deep lane-dense grid
    # (TN=8 -> LW=128, 8 grid steps -> 4 per v7x TensorCore).
    N, C, H, W = 64, 1, 16, 16
    x = jax.random.normal(kx, (N, C, H, W), jnp.float32) * 2.0
    # Conv2d(1,1,3) default bias init is U(-1/3, 1/3); init deterministically.
    bias = jax.random.uniform(kb, (3,), jnp.float32, minval=-1.0 / 3.0,
                              maxval=1.0 / 3.0)

    out = jax.block_until_ready(detection_head(x, bias))
    ref = jax.block_until_ready(detection_head_reference(x, bias))
    np.testing.assert_allclose(np.asarray(out), np.asarray(ref),
                               atol=1e-3, rtol=1e-3)
    print("KERNEL_OK")
</pallas_src>

<mosaic_0001>
module attributes {stable_mosaic.version = 11 : i64} {
  func.func @_detection_head_kernel(%arg0: i32, %arg1: memref<1xf32, #tpu.memory_space<smem>>, %arg2: memref<16x128xf32, #tpu.memory_space<vmem>>, %arg3: memref<16x128xf32, #tpu.memory_space<vmem>>) attributes {dimension_semantics = [#tpu.dimension_semantics<parallel>], iteration_bounds = array<i64: 8>, scalar_prefetch = 0 : i64, scratch_operands = 0 : i64, tpu.core_type = #tpu.core_type<tc>, window_params = [{transform_indices = @transform_0, window_bounds = array<i64: 1>}, {transform_indices = @transform_1, window_bounds = array<i64: 16, 128>}, {transform_indices = @transform_2, window_bounds = array<i64: 16, 128>}]} {
    %c0 = arith.constant 0 : index
    %c0_0 = arith.constant 0 : index
    %0 = vector.load %arg2[%c0, %c0_0] : memref<16x128xf32, #tpu.memory_space<vmem>>, vector<16x128xf32>
    %1 = arith.negf %0 : vector<16x128xf32>
    %2 = math.exp %1 : vector<16x128xf32>
    %cst = arith.constant 1.000000e+00 : f32
    %3 = vector.broadcast %cst : f32 to vector<16x128xf32>
    %4 = arith.addf %3, %2 : vector<16x128xf32>
    %5 = arith.divf %3, %4 : vector<16x128xf32>
    %6 = tpu.iota {dimensions = array<i32: 0>} : vector<16x128xi32>
    %7 = tpu.iota {dimensions = array<i32: 1>} : vector<16x128xi32>
    %c16_i32 = arith.constant 16 : i32
    %c0_i32 = arith.constant 0 : i32
    %8 = arith.cmpi eq, %c16_i32, %c0_i32 : i32
    %c1_i32 = arith.constant 1 : i32
    %9 = arith.select %8, %c1_i32, %c16_i32 : i32
    %10 = vector.broadcast %9 : i32 to vector<16x128xi32>
    %11 = arith.remsi %7, %10 : vector<16x128xi32>
    %c0_i32_1 = arith.constant 0 : i32
    %12 = vector.broadcast %c0_i32_1 : i32 to vector<16x128xi32>
    %13 = arith.cmpi ne, %11, %12 : vector<16x128xi32>
    %c0_i32_2 = arith.constant 0 : i32
    %14 = vector.broadcast %c0_i32_2 : i32 to vector<16x128xi32>
    %15 = arith.cmpi slt, %11, %14 : vector<16x128xi32>
    %c0_i32_3 = arith.constant 0 : i32
    %16 = arith.cmpi slt, %9, %c0_i32_3 : i32
    %17 = vector.broadcast %16 : i1 to vector<16x128xi1>
    %18 = vector.broadcast %17 : vector<16x128xi1> to vector<16x128xi1>
    %19 = arith.xori %15, %18 : vector<16x128xi1>
    %20 = arith.andi %19, %13 : vector<16x128xi1>
    %21 = vector.broadcast %9 : i32 to vector<16x128xi32>
    %22 = arith.addi %11, %21 : vector<16x128xi32>
    %23 = arith.select %20, %22, %11 : vector<16x128xi1>, vector<16x128xi32>
    %cst_4 = arith.constant 0.000000e+00 : f32
    %24 = vector.broadcast %cst_4 : f32 to vector<16x128xf32>
    %c15_i32 = arith.constant 15 : i32
    %25 = vector.broadcast %c15_i32 : i32 to vector<16x128xi32>
    %26 = arith.cmpi slt, %6, %25 : vector<16x128xi32>
    %c15_i32_5 = arith.constant 15 : i32
    %27 = tpu.dynamic_rotate %5 by %c15_i32_5 dim 0 : vector<16x128xf32>, i32 -> vector<16x128xf32>
    %cst_6 = arith.constant 0.000000e+00 : f32
    %28 = vector.broadcast %cst_6 : f32 to vector<16x128xf32>
    %29 = arith.select %26, %27, %28 : vector<16x128xi1>, vector<16x128xf32>
    %c1_i32_7 = arith.constant 1 : i32
    %30 = vector.broadcast %c1_i32_7 : i32 to vector<16x128xi32>
    %31 = arith.cmpi sge, %6, %30 : vector<16x128xi32>
    %c1_i32_8 = arith.constant 1 : i32
    %32 = tpu.dynamic_rotate %5 by %c1_i32_8 dim 0 : vector<16x128xf32>, i32 -> vector<16x128xf32>
    %cst_9 = arith.constant 0.000000e+00 : f32
    %33 = vector.broadcast %cst_9 : f32 to vector<16x128xf32>
    %34 = arith.select %31, %32, %33 : vector<16x128xi1>, vector<16x128xf32>
    %cst_10 = arith.constant 1.000000e+00 : f32
    %35 = vector.broadcast %cst_10 : f32 to vector<16x128xf32>
    %36 = arith.mulf %35, %5 : vector<16x128xf32>
    %37 = arith.addf %29, %34 : vector<16x128xf32>
    %cst_11 = arith.constant 0.882496893 : f32
    %38 = vector.broadcast %cst_11 : f32 to vector<16x128xf32>
    %39 = arith.mulf %38, %37 : vector<16x128xf32>
    %40 = arith.addf %36, %39 : vector<16x128xf32>
    %c15_i32_12 = arith.constant 15 : i32
    %41 = vector.broadcast %c15_i32_12 : i32 to vector<16x128xi32>
    %42 = arith.cmpi slt, %23, %41 : vector<16x128xi32>
    %c127_i32 = arith.constant 127 : i32
    %43 = tpu.dynamic_rotate %40 by %c127_i32 dim 1 : vector<16x128xf32>, i32 -> vector<16x128xf32>
    %cst_13 = arith.constant 0.000000e+00 : f32
    %44 = vector.broadcast %cst_13 : f32 to vector<16x128xf32>
    %45 = arith.select %42, %43, %44 : vector<16x128xi1>, vector<16x128xf32>
    %c1_i32_14 = arith.constant 1 : i32
    %46 = vector.broadcast %c1_i32_14 : i32 to vector<16x128xi32>
    %47 = arith.cmpi sge, %23, %46 : vector<16x128xi32>
    %c1_i32_15 = arith.constant 1 : i32
    %48 = tpu.dynamic_rotate %40 by %c1_i32_15 dim 1 : vector<16x128xf32>, i32 -> vector<16x128xf32>
    %cst_16 = arith.constant 0.000000e+00 : f32
    %49 = vector.broadcast %cst_16 : f32 to vector<16x128xf32>
    %50 = arith.select %47, %48, %49 : vector<16x128xi1>, vector<16x128xf32>
    %cst_17 = arith.constant 1.000000e+00 : f32
    %51 = vector.broadcast %cst_17 : f32 to vector<16x128xf32>
    %52 = arith.mulf %51, %40 : vector<16x128xf32>
    %53 = arith.addf %45, %50 : vector<16x128xf32>
    %cst_18 = arith.constant 0.882496893 : f32
    %54 = vector.broadcast %cst_18 : f32 to vector<16x128xf32>
    %55 = arith.mulf %54, %53 : vector<16x128xf32>
    %56 = arith.addf %52, %55 : vector<16x128xf32>
    %57 = arith.addf %24, %56 : vector<16x128xf32>
    %c14_i32 = arith.constant 14 : i32
    %58 = vector.broadcast %c14_i32 : i32 to vector<16x128xi32>
    %59 = arith.cmpi slt, %6, %58 : vector<16x128xi32>
    %c14_i32_19 = arith.constant 14 : i32
    %60 = tpu.dynamic_rotate %5 by %c14_i32_19 dim 0 : vector<16x128xf32>, i32 -> vector<16x128xf32>
    %cst_20 = arith.constant 0.000000e+00 : f32
    %61 = vector.broadcast %cst_20 : f32 to vector<16x128xf32>
    %62 = arith.select %59, %60, %61 : vector<16x128xi1>, vector<16x128xf32>
    %c2_i32 = arith.constant 2 : i32
    %63 = vector.broadcast %c2_i32 : i32 to vector<16x128xi32>
    %64 = arith.cmpi sge, %6, %63 : vector<16x128xi32>
    %c2_i32_21 = arith.constant 2 : i32
    %65 = tpu.dynamic_rotate %5 by %c2_i32_21 dim 0 : vector<16x128xf32>, i32 -> vector<16x128xf32>
    %cst_22 = arith.constant 0.000000e+00 : f32
    %66 = vector.broadcast %cst_22 : f32 to vector<16x128xf32>
    %67 = arith.select %64, %65, %66 : vector<16x128xi1>, vector<16x128xf32>
    %cst_23 = arith.constant 1.000000e+00 : f32
    %68 = vector.broadcast %cst_23 : f32 to vector<16x128xf32>
    %69 = arith.mulf %68, %5 : vector<16x128xf32>
    %70 = arith.addf %62, %67 : vector<16x128xf32>
    %cst_24 = arith.constant 0.882496893 : f32
    %71 = vector.broadcast %cst_24 : f32 to vector<16x128xf32>
    %72 = arith.mulf %71, %70 : vector<16x128xf32>
    %73 = arith.addf %69, %72 : vector<16x128xf32>
    %c14_i32_25 = arith.constant 14 : i32
    %74 = vector.broadcast %c14_i32_25 : i32 to vector<16x128xi32>
    %75 = arith.cmpi slt, %23, %74 : vector<16x128xi32>
    %c126_i32 = arith.constant 126 : i32
    %76 = tpu.dynamic_rotate %73 by %c126_i32 dim 1 : vector<16x128xf32>, i32 -> vector<16x128xf32>
    %cst_26 = arith.constant 0.000000e+00 : f32
    %77 = vector.broadcast %cst_26 : f32 to vector<16x128xf32>
    %78 = arith.select %75, %76, %77 : vector<16x128xi1>, vector<16x128xf32>
    %c2_i32_27 = arith.constant 2 : i32
    %79 = vector.broadcast %c2_i32_27 : i32 to vector<16x128xi32>
    %80 = arith.cmpi sge, %23, %79 : vector<16x128xi32>
    %c2_i32_28 = arith.constant 2 : i32
    %81 = tpu.dynamic_rotate %73 by %c2_i32_28 dim 1 : vector<16x128xf32>, i32 -> vector<16x128xf32>
    %cst_29 = arith.constant 0.000000e+00 : f32
    %82 = vector.broadcast %cst_29 : f32 to vector<16x128xf32>
    %83 = arith.select %80, %81, %82 : vector<16x128xi1>, vector<16x128xf32>
    %cst_30 = arith.constant 1.000000e+00 : f32
    %84 = vector.broadcast %cst_30 : f32 to vector<16x128xf32>
    %85 = arith.mulf %84, %73 : vector<16x128xf32>
    %86 = arith.addf %78, %83 : vector<16x128xf32>
    %cst_31 = arith.constant 0.882496893 : f32
    %87 = vector.broadcast %cst_31 : f32 to vector<16x128xf32>
    %88 = arith.mulf %87, %86 : vector<16x128xf32>
    %89 = arith.addf %85, %88 : vector<16x128xf32>
    %90 = arith.addf %57, %89 : vector<16x128xf32>
    %c13_i32 = arith.constant 13 : i32
    %91 = vector.broadcast %c13_i32 : i32 to vector<16x128xi32>
    %92 = arith.cmpi slt, %6, %91 : vector<16x128xi32>
    %c13_i32_32 = arith.constant 13 : i32
    %93 = tpu.dynamic_rotate %5 by %c13_i32_32 dim 0 : vector<16x128xf32>, i32 -> vector<16x128xf32>
    %cst_33 = arith.constant 0.000000e+00 : f32
    %94 = vector.broadcast %cst_33 : f32 to vector<16x128xf32>
    %95 = arith.select %92, %93, %94 : vector<16x128xi1>, vector<16x128xf32>
    %c3_i32 = arith.constant 3 : i32
    %96 = vector.broadcast %c3_i32 : i32 to vector<16x128xi32>
    %97 = arith.cmpi sge, %6, %96 : vector<16x128xi32>
    %c3_i32_34 = arith.constant 3 : i32
    %98 = tpu.dynamic_rotate %5 by %c3_i32_34 dim 0 : vector<16x128xf32>, i32 -> vector<16x128xf32>
    %cst_35 = arith.constant 0.000000e+00 : f32
    %99 = vector.broadcast %cst_35 : f32 to vector<16x128xf32>
    %100 = arith.select %97, %98, %99 : vector<16x128xi1>, vector<16x128xf32>
    %cst_36 = arith.constant 1.000000e+00 : f32
    %101 = vector.broadcast %cst_36 : f32 to vector<16x128xf32>
    %102 = arith.mulf %101, %5 : vector<16x128xf32>
    %103 = arith.addf %95, %100 : vector<16x128xf32>
    %cst_37 = arith.constant 0.882496893 : f32
    %104 = vector.broadcast %cst_37 : f32 to vector<16x128xf32>
    %105 = arith.mulf %104, %103 : vector<16x128xf32>
    %106 = arith.addf %102, %105 : vector<16x128xf32>
    %c13_i32_38 = arith.constant 13 : i32
    %107 = vector.broadcast %c13_i32_38 : i32 to vector<16x128xi32>
    %108 = arith.cmpi slt, %23, %107 : vector<16x128xi32>
    %c125_i32 = arith.constant 125 : i32
    %109 = tpu.dynamic_rotate %106 by %c125_i32 dim 1 : vector<16x128xf32>, i32 -> vector<16x128xf32>
    %cst_39 = arith.constant 0.000000e+00 : f32
    %110 = vector.broadcast %cst_39 : f32 to vector<16x128xf32>
    %111 = arith.select %108, %109, %110 : vector<16x128xi1>, vector<16x128xf32>
    %c3_i32_40 = arith.constant 3 : i32
    %112 = vector.broadcast %c3_i32_40 : i32 to vector<16x128xi32>
    %113 = arith.cmpi sge, %23, %112 : vector<16x128xi32>
    %c3_i32_41 = arith.constant 3 : i32
    %114 = tpu.dynamic_rotate %106 by %c3_i32_41 dim 1 : vector<16x128xf32>, i32 -> vector<16x128xf32>
    %cst_42 = arith.constant 0.000000e+00 : f32
    %115 = vector.broadcast %cst_42 : f32 to vector<16x128xf32>
    %116 = arith.select %113, %114, %115 : vector<16x128xi1>, vector<16x128xf32>
    %cst_43 = arith.constant 1.000000e+00 : f32
    %117 = vector.broadcast %cst_43 : f32 to vector<16x128xf32>
    %118 = arith.mulf %117, %106 : vector<16x128xf32>
    %119 = arith.addf %111, %116 : vector<16x128xf32>
    %cst_44 = arith.constant 0.882496893 : f32
    %120 = vector.broadcast %cst_44 : f32 to vector<16x128xf32>
    %121 = arith.mulf %120, %119 : vector<16x128xf32>
    %122 = arith.addf %118, %121 : vector<16x128xf32>
    %123 = arith.addf %90, %122 : vector<16x128xf32>
    %cst_45 = arith.constant 8.000000e-01 : f32
    %124 = vector.broadcast %cst_45 : f32 to vector<16x128xf32>
    %125 = arith.mulf %5, %124 : vector<16x128xf32>
    %cst_46 = arith.constant 0.00872007851 : f32
    %126 = vector.broadcast %cst_46 : f32 to vector<16x128xf32>
    %127 = arith.mulf %123, %126 : vector<16x128xf32>
    %128 = arith.addf %125, %127 : vector<16x128xf32>
    %c0_47 = arith.constant 0 : index
    %129 = memref.load %arg1[%c0_47] : memref<1xf32, #tpu.memory_space<smem>>
    %130 = vector.broadcast %129 : f32 to vector<16x128xf32>
    %131 = arith.addf %128, %130 : vector<16x128xf32>
    %cst_48 = arith.constant 0.000000e+00 : f32
    %cst_49 = arith.constant 1.000000e+00 : f32
    %132 = vector.broadcast %cst_48 : f32 to vector<16x128xf32>
    %133 = arith.maximumf %132, %131 : vector<16x128xf32>
    %134 = vector.broadcast %cst_49 : f32 to vector<16x128xf32>
    %135 = arith.minimumf %134, %133 : vector<16x128xf32>
    %c0_50 = arith.constant 0 : index
    %c0_51 = arith.constant 0 : index
    %136 = vector.load %arg3[%c0_50, %c0_51] : memref<16x128xf32, #tpu.memory_space<vmem>>, vector<16x128xf32>
    tpu.vector_store %arg3[%c0_50, %c0_51], %135 {strides = array<i32>} : memref<16x128xf32, #tpu.memory_space<vmem>>, vector<16x128xf32>,
    return
  }
  func.func @transform_0(%arg0: i32) -> i32 {
    %c0_i32 = arith.constant 0 : i32
    %c0_i32_0 = arith.constant 0 : i32
    return %c0_i32 : i32
  }
  func.func @transform_1(%arg0: i32) -> (i32, i32) {
    %c0_i32 = arith.constant 0 : i32
    %c0_i32_0 = arith.constant 0 : i32
    return %c0_i32, %arg0 : i32, i32
  }
  func.func @transform_2(%arg0: i32) -> (i32, i32) {
    %c0_i32 = arith.constant 0 : i32
    %c0_i32_0 = arith.constant 0 : i32
    return %c0_i32, %arg0 : i32, i32
  }
}

</mosaic_0001>

<bundles_post_ra>
// kernel: detection_head.1
= control target key start
LH: loop header
LB: loop body
LE: loop exit
PB: predicated region body
PF: predicated region fallthrough
CT: control target
= control target key end

     0   :  { %s732_s0 = inlined_call_operand.<no memory space> [shape: f32[1], index: 0, kind: input, shape index: {}]   ;;  %s733_s1 = inlined_call_operand.vmem [shape: f32[16,1024], index: 1, kind: input, shape index: {}]   ;;  %s734_s2 = inlined_call_operand.vmem [shape: f32[16,1024], index: 2, kind: output, shape index: {}]  }
   0x1   :  { %7 = sst [smem:[#allocation2]] %s732_s0 }
   0x2   :  { %s592_s11 = smov 0   ;;  %s594_s12 = smov 0  }
   0x3   :  { %s596_s13 = smov 0  }
   0x4 LB: > { %s491_s0 = sadd.s32 4294967295, %s566_s13   ;;  %s609_s14 = sadd.s32 1, %s566_s13   ;;  %s566_s13 = sphi %s596_s13, %s738_s13   ;;  %s562_s12 = sphi %s594_s12, %s737_s12   ;;  %s558_s11 = sphi %s592_s11, %s736_s11  }
   0x5   : > { %s38_s15 = ssub.s32 %s566_s13, %s609_s14  ;;  %s41_s16 = sadd.s32 1, %s562_s12 }
   0x6   : > { %p39_p0 = scmp.eq.s32.totalorder %s38_s15, 0  ;;  %p48_p1 = scmp.ne.s32.totalorder %s562_s12, %s558_s11 }
   0x7   : > { %p49_p2 = scmp.eq.s32.totalorder %s566_s13, 0  ;;  %p78_p3 = scmp.eq.s32.totalorder %s491_s0, 7 }
   0x8   : > { %s620_s17 = scalar_select %p39_p0, %s562_s12, %s41_s16  }
   0x9   : > { %p50_p4 = por %p49_p2, %p48_p1  ;;  %p622_p5 = por %p78_p3, %p48_p1 }
   0xa   : > { %p494_p6 = scmp.ge.s32.totalorder %s566_s13, 8 }
   0xc   : > { %103 = sbr.rel (%p494_p6) target bundleno = 23 (0x17), region = 20 }
  0x11   : > { %106 = sbr.rel (!%p50_p4) target bundleno = 23 (0x17), region = 24  ;;  %s108_s19 = sand.u32 (%p50_p4), 1, %s562_s12  }
  0x12   : > { %s496_s20 = sshll.u32 (%p50_p4), %s566_s13, 3  ;;  %s495_s21 = sshll.u32 (%p50_p4), %s108_s19, 4 }
  0x13   : > { %s112_s24 = scalar_lea.vmem (%p50_p4), %s733_s1, %s496_s20  ;;  %s110_s25 = scalar_lea.vmem (%p50_p4), [#allocation3], %s495_s21 }
  0x14   : > { %v143_v0 = vld [vmem:[%s112_s24] sm:$0xff] (%p50_p4) }
  0x15   : > { %v145_v1 = vld [vmem:[%s112_s24 + $0x40] sm:$0xff] (%p50_p4)  ;;  %144 = vst [vmem:[%s110_s25] sm:$0xff] (%p50_p4), %v143_v0 }
  0x16   : > { %146 = vst [vmem:[%s110_s25 + $0x8] sm:$0xff] %v145_v1 }
  0x17 PF: > { %p497_p7 = scmp.ge.s32.totalorder %s566_s13, 1  ;;  %p151_p8 = scmp.lt.s32.totalorder %s566_s13, 9 }
  0x19   : > { %p152_p9 = pnand %p497_p7, %p151_p8 }
  0x1a   : > { %s158_s26 = sand.u32 (!%p152_p9), 1, %s558_s11   ;;  %s568_s29 = smov (!%p152_p9), 1  }
  0x1b   : > { %155 = sbr.rel (%p152_p9) target bundleno = 240 (0xf0), region = 62  ;;  %s635_s27 = sshll.u32 (!%p152_p9), %s158_s26, 4 }
  0x1c   : > { %s160_s28 = scalar_lea.vmem (!%p152_p9), [#allocation3], %s635_s27  ;;  %s569_s30 = smov (!%p152_p9), 127  }
  0x1d   : > { %s570_s3 = smov (!%p152_p9), 126   ;;  %s571_s4 = smov (!%p152_p9), 2  }
  0x1e   : > { %s572_s5 = smov (!%p152_p9), 125   ;;  %s573_s6 = smov (!%p152_p9), 3  }
  0x1f   : > { %s379_s7 = sld [smem:[#allocation2]] (!%p152_p9)  ;;  %s177_s8 = scalar_lea.vmem (!%p152_p9), [#allocation4], %s635_s27 }
  0x20   : > { %v178_v2 = vld [vmem:[%s160_s28] sm:$0xff]  ;;  %v179_v3 = vld [vmem:[%s160_s28 + $0x8] sm:$0xff]  ;;  %v218_v13 = vlaneseq  ;;  %s503_s9 = sshll.u32 (%p622_p5), %s491_s0, 3 }
  0x21   : > { %v500_v4 = vmul.f32 -1.442695, %v178_v2  ;;  %v501_v5 = vmul.f32 -1.442695, %v179_v3  ;;  %s397_s15 = scalar_lea.vmem (%p622_p5), %s734_s2, %s503_s9 }
  0x22   : > { %v639_v22 = vshrl.u32 %v218_v13, 7 }
  0x23   : > { %536 = vpow2.f32 %v500_v4 }
  0x24   : > { %538 = vpow2.f32 %v501_v5  ;;  %v642_v27 = vadd.s32 8, %v639_v22  ;;  %vm239_vm8 = vcmp.lt.s32.totalorder %v639_v22, 7  ;;  %vm244_vm9 = vcmp.ge.s32.totalorder %v639_v22, 1 }
  0x25   : > { %vm248_vm10 = vcmp.lt.s32.totalorder %v639_v22, 1  ;;  %vm285_vm12 = vcmp.lt.s32.totalorder %v639_v22, 6  ;;  %vm294_vm13 = vcmp.lt.s32.totalorder %v639_v22, 2  ;;  %vm290_vm14 = vcmp.ge.s32.totalorder %v639_v22, 2 }
  0x26   : > { %vm236_vm11 = vcmp.lt.s32.totalorder %v642_v27, 15  ;;  %vm282_vm15 = vcmp.lt.s32.totalorder %v642_v27, 14 }
  0x29   : > { %v537_v6 = vpop.eup %536 }
  0x2a   : > { %v539_v7 = vpop.eup %538  ;;  %v186_v8 = vadd.f32 1.0, %v537_v6 }
  0x2b   : > { %v187_v9 = vadd.f32 1.0, %v539_v7 }
  0x2c   : > { %540 = vrcp.f32 %v186_v8  ;;  %vm193_vm0 = vweird.f32 %v186_v8  ;;  %v199_v14 = vand.u32 2147483648, %v186_v8  ;;  %v197_v17 = vand.u32 2147483647, %v186_v8 }
  0x2d   : > { %542 = vrcp.f32 %v187_v9  ;;  %v214_v18 = vand.u32 2147483648, %v187_v9  ;;  %vm208_vm2 = vweird.f32 %v187_v9  ;;  %v212_v20 = vand.u32 2147483647, %v187_v9 }
  0x2e   : > { %v200_v23 = vor.u32 1.1754944e-38, %v199_v14  ;;  %vm198_vm5 = vcmp.eq.f32.partialorder %v197_v17, 8.507059e+37 }
  0x2f   : > { %v215_v26 = vor.u32 1.1754944e-38, %v214_v18  ;;  %vm213_vm7 = vcmp.eq.f32.partialorder %v212_v20, 8.507059e+37 }
  0x32   : > { %v541_v10 = vpop.eup %540 }
  0x33   : > { %v543_v11 = vpop.eup %542  ;;  %v189_v12 = vmul.f32 %v541_v10, %v186_v8  ;;  %vm194_vm1 = vweird.f32 %v541_v10 }
  0x34   : > { %v204_v15 = vmul.f32 %v543_v11, %v187_v9  ;;  %vm209_vm3 = vweird.f32 %v543_v11  ;;  %vm195_vm4 = vmor %vm193_vm0, %vm194_vm1  ;;  %vm340_vm0 = vcmp.lt.s32.totalorder %v639_v22, 3  ;;  %vm331_vm1 = vcmp.lt.s32.totalorder %v639_v22, 5 }
  0x35   : > { %v190_v16 = vsub.f32 1.0, %v189_v12  ;;  %vm210_vm6 = vmor %vm208_vm2, %vm209_vm3  ;;  %vm336_vm2 = vcmp.ge.s32.totalorder %v639_v22, 3  ;;  %vm328_vm3 = vcmp.lt.s32.totalorder %v642_v27, 13  ;;  %v222_v22 = vand.u32 127, %v218_v13 }
  0x36   : > { %v205_v19 = vsub.f32 1.0, %v204_v15 }
  0x37   : > { %v191_v21 = vmul.f32 %v541_v10, %v190_v16 }
  0x38   : > { %v206_v24 = vmul.f32 %v543_v11, %v205_v19 }
  0x39   : > { %v192_v25 = vadd.f32 %v541_v10, %v191_v21 }
  0x3a   : > { %v207_v28 = vadd.f32 %v543_v11, %v206_v24 }
  0x3b   : > { %v196_v29 = vsel %vm195_vm4, %v541_v10, %v192_v25  ;;  %v227_v25 = vand.u32 15, %v222_v22 }
  0x3c   : > { %v645_v30 = vsel %vm198_vm5, %v200_v23, %v196_v29  ;;  %v211_v31 = vsel %vm210_vm6, %v543_v11, %v207_v28 }
  0x3d   : > { %v649_v32 = vsel %vm213_vm7, %v215_v26, %v211_v31  ;;  %v237_v33 = vrot.slane %v645_v30, 1  ;;  %v246_v34 = vrot.slane %v645_v30, 7  ;;  %v283_v37 = vrot.slane %v645_v30, 2 }
  0x3e   : > { %v238_v35 = vrot.slane %v649_v32, 1  ;;  %v247_v36 = vrot.slane %v649_v32, 7  ;;  %v284_v38 = vrot.slane %v649_v32, 2  ;;  %v292_v39 = vrot.slane %v645_v30, 6 }
  0x3f   : > { %v293_v40 = vrot.slane %v649_v32, 6  ;;  %v338_v59 = vrot.slane %v645_v30, 5  ;;  %v339_v60 = vrot.slane %v649_v32, 5  ;;  %v329_v0 = vrot.slane %v645_v30, 3 }
  0x40   : > { %v240_v41 = vsel %vm239_vm8, %v237_v33, %v238_v35  ;;  %v250_v42 = vsel %vm248_vm10, %v247_v36, %v246_v34  ;;  %v241_v43 = vsel %vm239_vm8, %v238_v35, %v237_v33  ;;  %v249_v46 = vsel %vm248_vm10, %v246_v34, %v247_v36 }
  0x41   : > { %v251_v44 = vsel %vm244_vm9, %v250_v42, 0.0  ;;  %v243_v45 = vsel %vm236_vm11, %v241_v43, 0.0  ;;  %v286_v48 = vsel %vm285_vm12, %v283_v37, %v284_v38  ;;  %v287_v49 = vsel %vm285_vm12, %v284_v38, %v283_v37 }
  0x42   : > { %v253_v47 = vadd.f32 %v251_v44, %v240_v41  ;;  %v296_v50 = vsel %vm294_vm13, %v293_v40, %v292_v39  ;;  %v254_v52 = vadd.f32 %v249_v46, %v243_v45  ;;  %v289_v56 = vsel %vm282_vm15, %v287_v49, 0.0 }
  0x43   : > { %v297_v53 = vsel %vm290_vm14, %v296_v50, 0.0  ;;  %v295_v57 = vsel %vm294_vm13, %v292_v39, %v293_v40  ;;  %v330_v1 = vrot.slane %v649_v32, 3  ;;  %v342_v2 = vsel %vm340_vm0, %v339_v60, %v338_v59 }
  0x44   : > { %v255_v51 = vmul.f32 0.8824969, %v253_v47  ;;  %v299_v54 = vadd.f32 %v297_v53, %v286_v48  ;;  %v256_v61 = vmul.f32 0.8824969, %v254_v52  ;;  %v300_v62 = vadd.f32 %v295_v57, %v289_v56 }
  0x45   : > { %v332_v5 = vsel %vm331_vm1, %v329_v0, %v330_v1  ;;  %v343_v6 = vsel %vm336_vm2, %v342_v2, 0.0  ;;  %v333_v7 = vsel %vm331_vm1, %v330_v1, %v329_v0  ;;  %v341_v11 = vsel %vm340_vm0, %v338_v59, %v339_v60 }
  0x46   : > { %v677_v55 = vadd.f32 %v255_v51, %v645_v30  ;;  %v301_v58 = vmul.f32 0.8824969, %v299_v54  ;;  %v697_v3 = vadd.f32 %v256_v61, %v649_v32  ;;  %v302_v4 = vmul.f32 0.8824969, %v300_v62 }
  0x47   : > { %v345_v9 = vadd.f32 %v343_v6, %v332_v5  ;;  %v335_v10 = vsel %vm328_vm3, %v333_v7, 0.0  ;;  %vm305_vm4 = vcmp.lt.s32.totalorder %v227_v25, 14  ;;  %vm266_vm5 = vcmp.ge.s32.totalorder %v227_v25, 1 }
  0x48   : > { %267 = vrot.lane.b32.xlu1 %v677_v55, %s568_s29  ;;  %260 = vrot.lane.b32.xlu0 %v677_v55, %s569_s30  ;;  %v687_v63 = vadd.f32 %v301_v58, %v645_v30  ;;  %v304_v8 = vadd.f32 %v302_v4, %v649_v32  ;;  %v346_v12 = vadd.f32 %v341_v11, %v335_v10  ;;  %vm259_vm6 = vcmp.lt.s32.totalorder %v227_v25, 15 }
  0x49   : > { %v347_v14 = vmul.f32 0.8824969, %v345_v9  ;;  %vm312_vm7 = vcmp.ge.s32.totalorder %v227_v25, 2  ;;  %vm358_vm8 = vcmp.ge.s32.totalorder %v227_v25, 3  ;;  %vm351_vm9 = vcmp.lt.s32.totalorder %v227_v25, 13 }
  0x4a   : > { %306 = vrot.lane.b32.xlu2 %v687_v63, %s570_s3  ;;  %v348_v15 = vmul.f32 0.8824969, %v346_v12  ;;  %v373_v4 = vmul.f32 0.8, %v645_v30  ;;  %v374_v6 = vmul.f32 0.8, %v649_v32  ;;  %v380_v9 = vstv %s379_s7 }
  0x4b   : > { %v349_v16 = vadd.f32 %v347_v14, %v645_v30 }
  0x4c   : > { %v350_v17 = vadd.f32 %v348_v15, %v649_v32 }
  0x50   : > { %269 = vrot.lane.b32.xlu1 %v697_v3, %s568_s29  ;;  %262 = vrot.lane.b32.xlu0 %v697_v3, %s569_s30 }
  0x52   : > { %308 = vrot.lane.b32.xlu2 %v304_v8, %s570_s3 }
  0x58   : > { %315 = vrot.lane.b32.xlu1 %v304_v8, %s571_s4  ;;  %313 = vrot.lane.b32.xlu0 %v687_v63, %s571_s4 }
  0x5a   : > { %352 = vrot.lane.b32.xlu2 %v349_v16, %s572_s5 }
  0x60   : > { %359 = vrot.lane.b32.xlu1 %v349_v16, %s573_s6  ;;  %354 = vrot.lane.b32.xlu0 %v350_v17, %s572_s5 }
  0x62   : > { %361 = vrot.lane.b32.xlu2 %v350_v17, %s573_s6 }
  0xa4   : > { %v307_v18 = vpop.permute.xlu2 %306 }
  0xa5   : > { %v310_v27 = vsel %vm305_vm4, %v307_v18, 0.0 }
  0xac   : > { %v309_v19 = vpop.permute.xlu2 %308 }
  0xad   : > { %v311_v31 = vsel %vm305_vm4, %v309_v19, 0.0 }
  0xb4   : > { %v353_v26 = vpop.permute.xlu2 %352 }
  0xb5   : > { %v356_v50 = vsel %vm351_vm9, %v353_v26, 0.0 }
  0xba   : > { %v268_v20 = vpop.permute.xlu1 %267  ;;  %v261_v21 = vpop.permute.xlu0 %260 }
  0xbb   : > { %v271_v28 = vsel %vm266_vm5, %v268_v20, 0.0  ;;  %v264_v29 = vsel %vm259_vm6, %v261_v21, 0.0 }
  0xbc   : > { %v273_v40 = vadd.f32 %v271_v28, %v264_v29  ;;  %v362_v42 = vpop.permute.xlu2 %361 }
  0xbd   : > { %v364_v45 = vsel %vm358_vm8, %v362_v42, 0.0 }
  0xbe   : > { %v275_v46 = vmul.f32 0.8824969, %v273_v40 }
  0xc0   : > { %v277_v58 = vadd.f32 %v275_v46, %v677_v55 }
  0xc2   : > { %v270_v23 = vpop.permute.xlu1 %269  ;;  %v263_v24 = vpop.permute.xlu0 %262 }
  0xc3   : > { %v272_v35 = vsel %vm266_vm5, %v270_v23, 0.0  ;;  %v265_v36 = vsel %vm259_vm6, %v263_v24, 0.0 }
  0xc4   : > { %v274_v41 = vadd.f32 %v272_v35, %v265_v36 }
  0xc6   : > { %v276_v47 = vmul.f32 0.8824969, %v274_v41 }
  0xc8   : > { %v278_v59 = vadd.f32 %v276_v47, %v697_v3 }
  0xca   : > { %v316_v33 = vpop.permute.xlu1 %315  ;;  %v314_v34 = vpop.permute.xlu0 %313 }
  0xcb   : > { %v318_v37 = vsel %vm312_vm7, %v316_v33, 0.0  ;;  %v317_v38 = vsel %vm312_vm7, %v314_v34, 0.0 }
  0xcc   : > { %v320_v39 = vadd.f32 %v318_v37, %v311_v31  ;;  %v319_v13 = vadd.f32 %v317_v38, %v310_v27 }
  0xce   : > { %v322_v43 = vmul.f32 0.8824969, %v320_v39  ;;  %v321_v44 = vmul.f32 0.8824969, %v319_v13 }
  0xd0   : > { %v324_v53 = vadd.f32 %v322_v43, %v304_v8  ;;  %v323_v54 = vadd.f32 %v321_v44, %v687_v63 }
  0xd2   : > { %v360_v48 = vpop.permute.xlu1 %359  ;;  %v355_v49 = vpop.permute.xlu0 %354  ;;  %v326_v62 = vadd.f32 %v324_v53, %v278_v59  ;;  %v325_v0 = vadd.f32 %v323_v54, %v277_v58 }
  0xd3   : > { %v363_v51 = vsel %vm358_vm8, %v360_v48, 0.0  ;;  %v357_v52 = vsel %vm351_vm9, %v355_v49, 0.0 }
  0xd4   : > { %v365_v56 = vadd.f32 %v363_v51, %v356_v50  ;;  %v366_v57 = vadd.f32 %v364_v45, %v357_v52 }
  0xd6   : > { %v367_v60 = vmul.f32 0.8824969, %v365_v56  ;;  %v368_v61 = vmul.f32 0.8824969, %v366_v57 }
  0xd8   : > { %v369_v1 = vadd.f32 %v367_v60, %v349_v16  ;;  %v370_v2 = vadd.f32 %v368_v61, %v350_v17 }
  0xda   : > { %v371_v5 = vadd.f32 %v369_v1, %v325_v0  ;;  %v372_v63 = vadd.f32 %v370_v2, %v326_v62 }
  0xdc   : > { %v375_v7 = vmul.f32 0.0087200785, %v371_v5  ;;  %v376_v8 = vmul.f32 0.0087200785, %v372_v63 }
  0xde   : > { %v377_v10 = vadd.f32 %v375_v7, %v373_v4  ;;  %v378_v55 = vadd.f32 %v376_v8, %v374_v6 }
  0xe0   : > { %v381_v11 = vadd.f32 %v380_v9, %v377_v10  ;;  %v382_v3 = vadd.f32 %v380_v9, %v378_v55 }
  0xe2   : > { %v383_v12 = vmax.f32 %v381_v11, 0.0  ;;  %v384_v14 = vmax.f32 %v382_v3, 0.0 }
  0xe3   : > { %395 = sbr.rel (!%p622_p5) target bundleno = 240 (0xf0), region = 70 }
  0xe4   : > { %v385_v15 = vmin.f32 %v383_v12, 1.0  ;;  %v386_v18 = vmin.f32 %v384_v14, 1.0 }
  0xe6   : > { %387 = vst [vmem:[%s177_s8] sm:$0xff] %v385_v15 }
  0xe7   : > { %388 = vst [vmem:[%s177_s8 + $0x8] sm:$0xff] %v386_v18 }
  0xed   : > { %v428_v30 = vld [vmem:[%s177_s8] sm:$0xff] }
  0xee   : > { %v430_v32 = vld [vmem:[%s177_s8 + $0x8] sm:$0xff]  ;;  %429 = vst [vmem:[%s397_s15] sm:$0xff] %v428_v30 }
  0xef   : > { %431 = vst [vmem:[%s397_s15 + $0x40] sm:$0xff] %v430_v32 }
  0xf0 PF: > { %p10_p10 = scmp.ge.s32.totalorder %s609_s14, 10   ;;  %s736_s11 = smov %s562_s12 }
  0xf1   : > { %s737_s12 = smov %s620_s17  ;;  %s738_s13 = smov %s609_s14 }
  0xf2   :  { %12 = sbr.rel (!%p10_p10) target bundleno = 4 (0x4), region = 139 }

</bundles_post_ra>
